<compile_context>
chip_gen: v7x
topology: tpu7x:2x2x1
jax: 0.10.0
libtpu: 0.0.40
codegen_flags: <defaults>
</compile_context>

<pallas_src>
import math

import jax
import jax.numpy as jnp
from jax.experimental import pallas as pl
from jax.experimental.pallas import tpu as pltpu


def _round_up(a, b):
    return (a + b - 1) // b * b


def _make_conv_kernel(tap_offsets, c_pad, tq, win, n_tiles, has_bias):
    """Stride-1 conv tile kernel.

    Per (batch, q-tile) grid step:
      1. manual double-buffered DMA of the (c_pad, win) input window HBM->VMEM
      2. in-kernel im2col: K*K statically shifted (c_pad, tq) slices stacked
         into a (K*K*c_pad, tq) VMEM scratch
      3. one MXU contraction against the stacked (oc_pad, K*K*c_pad) weights
    """

    def kernel(x_hbm, w_ref, *rest):
        if has_bias:
            b_ref, o_ref, xwin, sem, rhs = rest
        else:
            o_ref, xwin, sem, rhs = rest

        nn = pl.program_id(0)
        tt = pl.program_id(1)
        slot = tt % 2

        def window_copy(batch, tile, s):
            q0 = pl.multiple_of(tile * tq, 128)   # tq is a multiple of 128
            return pltpu.make_async_copy(
                x_hbm.at[batch, :, pl.ds(q0, win)], xwin.at[s], sem.at[s])

        # Prime the pipeline on the first tile of every image; later tiles'
        # windows were prefetched by the previous grid step (tt is an
        # "arbitrary" axis, so it runs sequentially on one core).
        @pl.when(tt == 0)
        def _():
            window_copy(nn, tt, slot).start()

        # Wait for the current tile's window.
        window_copy(nn, tt, slot).wait()

        # Prefetch the next tile's window (same image only) into the other slot.
        @pl.when(tt + 1 < n_tiles)
        def _():
            window_copy(nn, tt + 1, 1 - slot).start()

        # In-kernel im2col: tap offsets are STATIC shifts into the VMEM window,
        # so these are plain slice copies on the otherwise idle vld/vst slots.
        src = xwin.at[slot]
        for idx, d in enumerate(tap_offsets):
            rhs[pl.ds(idx * c_pad, c_pad), :] = src[:, pl.ds(d, tq)]

        # Single big MXU contraction over K*K*c_pad, f32 accumulation.
        acc = jnp.dot(w_ref[...], rhs[...], preferred_element_type=jnp.float32)
        if has_bias:
            acc = acc + b_ref[...]                 # (oc_pad, 1) broadcast, f32
        o_ref[0] = acc.astype(o_ref.dtype)

    return kernel


def equal_conv2d(x, weight, bias=None, *, stride=1, padding=0, tile_q=512,
                 use_bf16=False):
    """EqualConv2d forward.

    x:      (N, C, H, W)   float32 (NCHW, same as PyTorch)
    weight: (OC, C, K, K)  float32
    bias:   (OC,) float32 or None
    """
    n, c, h, w = x.shape
    oc, c_w, kh, kw = weight.shape
    assert c == c_w and kh == kw, "expects square kernel and matching channels"
    k = kh
    scale = 1.0 / math.sqrt(c * k * k)

    # output size (PyTorch conv2d formula)
    oh = (h + 2 * padding - k) // stride + 1
    ow = (w + 2 * padding - k) // stride + 1

    # ---------------- wrapper glue: pad, fold stride into channels ----------
    xp = jnp.pad(x, ((0, 0), (0, 0), (padding, padding), (padding, padding)))
    hp, wp_ = h + 2 * padding, w + 2 * padding
    w_s = weight * scale

    if stride > 1:
        # Exact polyphase / space-to-depth rewrite: stride-s conv over (HP,WP)
        # == stride-1 conv over (ceil(HP/s), ceil(WP/s)) with C*s*s channels
        # and kernel ceil(K/s) (zero-padded taps).  Channel order: (c, pi, pj).
        s = stride
        hq, wq = -(-hp // s), -(-wp_ // s)
        kq = -(-k // s)
        xp = jnp.pad(xp, ((0, 0), (0, 0), (0, hq * s - hp), (0, wq * s - wp_)))
        xp = (xp.reshape(n, c, hq, s, wq, s)
                .transpose(0, 1, 3, 5, 2, 4)
                .reshape(n, c * s * s, hq, wq))
        wpad = jnp.pad(w_s, ((0, 0), (0, 0), (0, kq * s - k), (0, kq * s - k)))
        w_s = (wpad.reshape(oc, c, kq, s, kq, s)
                   .transpose(0, 1, 3, 5, 2, 4)
                   .reshape(oc, c * s * s, kq, kq))
        c_eff, k_eff, wp_eff = c * s * s, kq, wq
        flat = hq * wq
    else:
        c_eff, k_eff, wp_eff = c, k, wp_
        flat = hp * wp_

    cdtype = jnp.bfloat16 if use_bf16 else x.dtype   # matmul operand dtype
    n_taps = k_eff * k_eff
    c_pad = _round_up(c_eff, 8)          # sublane-aligned channel blocks
    oc_p = _round_up(oc, 8)
    kdim = n_taps * c_pad                # stacked contraction dimension
    dmax = (k_eff - 1) * (wp_eff + 1)    # largest flat tap offset

    # Flat output coords q = y*WP_eff + x; columns x >= OW are halo garbage
    # cropped after the kernel.
    q_needed = oh * wp_eff
    tq = max(128, min(_round_up(tile_q, 128), _round_up(q_needed, 128)))
    n_tiles = pl.cdiv(q_needed, tq)
    q_pad = n_tiles * tq
    win = _round_up(tq + dmax, 128)                   # per-tile input window
    flat_pad = max(flat, (n_tiles - 1) * tq + win)    # keep window DMAs in-bounds

    # Flat, channel/width zero-padded input.  It stays in HBM; the kernel DMAs
    # only the per-tile window into VMEM (VMEM use independent of image size).
    x_flat = jnp.pad(xp.reshape(n, c_eff, flat),
                     ((0, 0), (0, c_pad - c_eff), (0, flat_pad - flat))
                     ).astype(cdtype)

    # Stacked weight matrix (oc_pad, n_taps*c_pad): columns
    # [idx*c_pad, idx*c_pad+c_eff) hold tap (ki, kj) with idx = ki*k_eff + kj.
    # TODO(synk): pad kdim / oc_p to multiples of 256 on v6e/v7x when the
    # channel count is large enough to make the padding cheap.
    w_taps = jnp.transpose(w_s, (0, 2, 3, 1)).reshape(oc, n_taps, c_eff)
    w_taps = jnp.pad(w_taps, ((0, oc_p - oc), (0, 0), (0, c_pad - c_eff)))
    w_stack = w_taps.reshape(oc_p, kdim).astype(cdtype)

    tap_offsets = [ki * wp_eff + kj for ki in range(k_eff) for kj in range(k_eff)]

    has_bias = bias is not None
    kernel = _make_conv_kernel(tap_offsets, c_pad, tq, win, n_tiles, has_bias)

    in_specs = [
        pl.BlockSpec(memory_space=pl.ANY),                     # image in HBM
        pl.BlockSpec((oc_p, kdim), lambda nn, tt: (0, 0)),      # stacked weights
    ]
    args = [x_flat, w_stack]
    if has_bias:
        in_specs.append(pl.BlockSpec((oc_p, 1), lambda nn, tt: (0, 0)))
        args.append(jnp.pad(bias.astype(jnp.float32), (0, oc_p - oc)).reshape(oc_p, 1))

    scratch_shapes = [
        pltpu.VMEM((2, c_pad, win), cdtype),     # manual double-buffered window
        pltpu.SemaphoreType.DMA((2,)),
        pltpu.VMEM((kdim, tq), cdtype),          # stacked im2col RHS
    ]

    # ----- accurate VMEM budget (no double counting) + generation-aware cap --
    cbytes = jnp.dtype(cdtype).itemsize
    obytes = jnp.dtype(x.dtype).itemsize
    vmem_need = (
        2 * oc_p * _round_up(kdim, 128) * cbytes      # weight block (2 bufs)
        + (2 * oc_p * 128 * 4 if has_bias else 0)     # bias block (2 bufs)
        + 2 * oc_p * tq * obytes                      # output tile (2 bufs)
        + 2 * c_pad * win * cbytes                    # manual window buffers
        + _round_up(kdim, 8) * tq * cbytes            # im2col scratch
        + oc_p * tq * 4                               # f32 matmul result
    )
    vmem_need = int(vmem_need * 1.25) + (1 << 20)     # headroom for Mosaic scratch
    try:
        vmem_cap = int(pltpu.get_tpu_info().vmem_capacity_bytes)
    except Exception:                                 # conservative fallback = v7x
        vmem_cap = 64 * 2 ** 20
    vmem_limit = int(min(vmem_cap * 7 // 8, max(vmem_need, 32 * 2 ** 20)))

    cost = pl.CostEstimate(
        flops=2 * n * n_tiles * tq * kdim * oc_p,
        transcendentals=0,
        bytes_accessed=int(n * n_tiles * c_pad * win * cbytes
                           + oc_p * kdim * cbytes
                           + n * oc_p * q_pad * obytes),
    )

    out_flat = pl.pallas_call(
        kernel,
        out_shape=jax.ShapeDtypeStruct((n, oc_p, q_pad), x.dtype),
        grid_spec=pltpu.PrefetchScalarGridSpec(
            num_scalar_prefetch=0,
            grid=(n, n_tiles),
            in_specs=in_specs,
            # lane-dense output: last dim tq is a multiple of 128
            out_specs=pl.BlockSpec((1, oc_p, tq), lambda nn, tt: (nn, 0, tt)),
            scratch_shapes=scratch_shapes,
        ),
        compiler_params=pltpu.CompilerParams(
            # The inner q-tile axis carries the manual DMA double-buffer state,
            # so it must stay sequential on one core ("arbitrary"); batches are
            # sharded across TensorCores.
            # TODO(synk): for N==1 workloads, shard disjoint row blocks of the
            # image across the two v7x TensorCores instead of batches.
            dimension_semantics=("parallel", "arbitrary"),
            vmem_limit_bytes=vmem_limit,
        ),
        cost_estimate=cost,
    )(*args)

    # flat (N, OC_pad, OH*WP_eff) is already NCHW order: crop pad + halo cols.
    out = (out_flat[:, :oc, :oh * wp_eff]
           .reshape(n, oc, oh, wp_eff)[:, :, :, :ow])
    return out


if __name__ == "__main__":
    key = jax.random.PRNGKey(0)
    kw_, kb_, kx_ = jax.random.split(key, 3)

    in_channel, out_channel, kernel_size = 4, 8, 3
    weight = jax.random.normal(
        kw_, (out_channel, in_channel, kernel_size, kernel_size), dtype=jnp.float32)
    bias = 0.1 * jax.random.normal(kb_, (out_channel,), dtype=jnp.float32)
    x = jax.random.normal(kx_, (2, 4, 16, 16), dtype=jnp.float32)
    scale = 1.0 / math.sqrt(in_channel * kernel_size ** 2)

    # --- test 1: stride=1, padding=1, bias; tile_q=128 exercises the
    # multi-tile manual double-buffered DMA path even at this tiny size.
    out1 = equal_conv2d(x, weight, bias, stride=1, padding=1, tile_q=128)
    out1 = jax.block_until_ready(out1)
    ref1 = jax.lax.conv_general_dilated(
        x, weight * scale, window_strides=(1, 1), padding=((1, 1), (1, 1)),
        dimension_numbers=("NCHW", "OIHW", "NCHW")) + bias.reshape(1, -1, 1, 1)
    assert out1.shape == (2, 8, 16, 16), out1.shape
    assert jnp.allclose(out1, ref1, atol=1e-4, rtol=1e-4)

    # --- test 2: stride=2 (polyphase path), padding=1, no bias.
    out2 = equal_conv2d(x, weight, None, stride=2, padding=1)
    out2 = jax.block_until_ready(out2)
    ref2 = jax.lax.conv_general_dilated(
        x, weight * scale, window_strides=(2, 2), padding=((1, 1), (1, 1)),
        dimension_numbers=("NCHW", "OIHW", "NCHW"))
    assert out2.shape == (2, 8, 8, 8), out2.shape
    assert jnp.allclose(out2, ref2, atol=1e-4, rtol=1e-4)

    print("KERNEL_OK")
</pallas_src>

<mosaic_0001>
module attributes {stable_mosaic.version = 11 : i64} {
  func.func @kernel(%arg0: i32, %arg1: i32, %arg2: memref<2x8x512xf32, #tpu.memory_space<any>>, %arg3: memref<8x72xf32, #tpu.memory_space<vmem>>, %arg4: memref<8x1xf32, #tpu.memory_space<vmem>>, %arg5: memref<1x8x128xf32, #tpu.memory_space<vmem>>, %arg6: memref<2x8x256xf32, #tpu.memory_space<vmem>>, %arg7: memref<2x!tpu.dma_semaphore, #tpu.memory_space<semaphore_mem>>, %arg8: memref<72x128xf32, #tpu.memory_space<vmem>>) attributes {dimension_semantics = [#tpu.dimension_semantics<parallel>, #tpu.dimension_semantics<arbitrary>], iteration_bounds = array<i64: 2, 3>, scalar_prefetch = 0 : i64, scratch_operands = 3 : i64, tpu.core_type = #tpu.core_type<tc>, window_params = [{}, {pipeline_mode = #tpu.pipeline_mode<synchronous>, transform_indices = @transform_1, window_bounds = array<i64: 8, 72>}, {pipeline_mode = #tpu.pipeline_mode<synchronous>, transform_indices = @transform_2, window_bounds = array<i64: 8, 1>}, {transform_indices = @transform_3, window_bounds = array<i64: 1, 8, 128>}]} {
    %c2_i32 = arith.constant 2 : i32
    %c0_i32 = arith.constant 0 : i32
    %0 = arith.cmpi eq, %c2_i32, %c0_i32 : i32
    %c1_i32 = arith.constant 1 : i32
    %1 = arith.select %0, %c1_i32, %c2_i32 : i32
    %2 = arith.remsi %arg1, %1 : i32
    %c0_i32_0 = arith.constant 0 : i32
    %3 = arith.cmpi ne, %2, %c0_i32_0 : i32
    %c0_i32_1 = arith.constant 0 : i32
    %4 = arith.cmpi slt, %2, %c0_i32_1 : i32
    %c0_i32_2 = arith.constant 0 : i32
    %5 = arith.cmpi slt, %1, %c0_i32_2 : i32
    %6 = arith.xori %4, %5 : i1
    %7 = arith.andi %6, %3 : i1
    %8 = arith.addi %2, %1 : i32
    %9 = arith.select %7, %8, %2 : i32
    %c0_i32_3 = arith.constant 0 : i32
    %10 = arith.cmpi eq, %arg1, %c0_i32_3 : i32
    %11 = arith.extui %10 : i1 to i32
    %c0_i32_4 = arith.constant 0 : i32
    %12 = arith.cmpi ne, %11, %c0_i32_4 : i32
    scf.if %12 {
      %c128_i32_56 = arith.constant 128 : i32
      %70 = arith.muli %arg1, %c128_i32_56 : i32
      %71 = tpu.assume_multiple %70, 128 : i32
      %c0_i32_57 = arith.constant 0 : i32
      %72 = tpu.memref_slice %arg2[%arg0, %c0_i32_57, %71] : memref<2x8x512xf32, #tpu.memory_space<any>> -> memref<1x8x256xf32, #tpu.memory_space<any>>
      %73 = tpu.memref_squeeze %72 : memref<1x8x256xf32, #tpu.memory_space<any>> -> memref<8x256xf32, #tpu.memory_space<any>>
      %c0_i32_58 = arith.constant 0 : i32
      %c0_i32_59 = arith.constant 0 : i32
      %74 = tpu.memref_slice %arg6[%9, %c0_i32_58, %c0_i32_59] : memref<2x8x256xf32, #tpu.memory_space<vmem>> -> memref<1x8x256xf32, #tpu.memory_space<vmem>>
      %75 = tpu.memref_squeeze %74 : memref<1x8x256xf32, #tpu.memory_space<vmem>> -> memref<8x256xf32, #tpu.memory_space<vmem>>
      %76 = tpu.memref_slice %arg7[%9] : memref<2x!tpu.dma_semaphore, #tpu.memory_space<semaphore_mem>> -> memref<1x!tpu.dma_semaphore, #tpu.memory_space<semaphore_mem>>
      %77 = tpu.memref_squeeze %76 : memref<1x!tpu.dma_semaphore, #tpu.memory_space<semaphore_mem>> -> memref<!tpu.dma_semaphore, #tpu.memory_space<semaphore_mem>>
      tpu.enqueue_dma source(%73 : memref<8x256xf32, #tpu.memory_space<any>>) target(%75 : memref<8x256xf32, #tpu.memory_space<vmem>>) target_semaphore(%77 : memref<!tpu.dma_semaphore, #tpu.memory_space<semaphore_mem>>)
    } else {
    }
    %c128_i32 = arith.constant 128 : i32
    %13 = arith.muli %arg1, %c128_i32 : i32
    %14 = tpu.assume_multiple %13, 128 : i32
    %c0_i32_5 = arith.constant 0 : i32
    %15 = tpu.memref_slice %arg2[%arg0, %c0_i32_5, %14] : memref<2x8x512xf32, #tpu.memory_space<any>> -> memref<1x8x256xf32, #tpu.memory_space<any>>
    %16 = tpu.memref_squeeze %15 : memref<1x8x256xf32, #tpu.memory_space<any>> -> memref<8x256xf32, #tpu.memory_space<any>>
    %c0_i32_6 = arith.constant 0 : i32
    %c0_i32_7 = arith.constant 0 : i32
    %17 = tpu.memref_slice %arg6[%9, %c0_i32_6, %c0_i32_7] : memref<2x8x256xf32, #tpu.memory_space<vmem>> -> memref<1x8x256xf32, #tpu.memory_space<vmem>>
    %18 = tpu.memref_squeeze %17 : memref<1x8x256xf32, #tpu.memory_space<vmem>> -> memref<8x256xf32, #tpu.memory_space<vmem>>
    %19 = tpu.memref_slice %arg7[%9] : memref<2x!tpu.dma_semaphore, #tpu.memory_space<semaphore_mem>> -> memref<1x!tpu.dma_semaphore, #tpu.memory_space<semaphore_mem>>
    %20 = tpu.memref_squeeze %19 : memref<1x!tpu.dma_semaphore, #tpu.memory_space<semaphore_mem>> -> memref<!tpu.dma_semaphore, #tpu.memory_space<semaphore_mem>>
    tpu.wait_dma2 semaphore(%20 : memref<!tpu.dma_semaphore, #tpu.memory_space<semaphore_mem>>) src(%16 : memref<8x256xf32, #tpu.memory_space<any>>) dst(%18 : memref<8x256xf32, #tpu.memory_space<vmem>>)
    %c1_i32_8 = arith.constant 1 : i32
    %21 = arith.addi %arg1, %c1_i32_8 : i32
    %c3_i32 = arith.constant 3 : i32
    %22 = arith.cmpi slt, %21, %c3_i32 : i32
    %23 = arith.extui %22 : i1 to i32
    %c0_i32_9 = arith.constant 0 : i32
    %24 = arith.cmpi ne, %23, %c0_i32_9 : i32
    scf.if %24 {
      %c1_i32_56 = arith.constant 1 : i32
      %70 = arith.addi %arg1, %c1_i32_56 : i32
      %c1_i32_57 = arith.constant 1 : i32
      %71 = arith.subi %c1_i32_57, %9 : i32
      %c128_i32_58 = arith.constant 128 : i32
      %72 = arith.muli %70, %c128_i32_58 : i32
      %73 = tpu.assume_multiple %72, 128 : i32
      %c0_i32_59 = arith.constant 0 : i32
      %74 = tpu.memref_slice %arg2[%arg0, %c0_i32_59, %73] : memref<2x8x512xf32, #tpu.memory_space<any>> -> memref<1x8x256xf32, #tpu.memory_space<any>>
      %75 = tpu.memref_squeeze %74 : memref<1x8x256xf32, #tpu.memory_space<any>> -> memref<8x256xf32, #tpu.memory_space<any>>
      %c0_i32_60 = arith.constant 0 : i32
      %c0_i32_61 = arith.constant 0 : i32
      %76 = tpu.memref_slice %arg6[%71, %c0_i32_60, %c0_i32_61] : memref<2x8x256xf32, #tpu.memory_space<vmem>> -> memref<1x8x256xf32, #tpu.memory_space<vmem>>
      %77 = tpu.memref_squeeze %76 : memref<1x8x256xf32, #tpu.memory_space<vmem>> -> memref<8x256xf32, #tpu.memory_space<vmem>>
      %78 = tpu.memref_slice %arg7[%71] : memref<2x!tpu.dma_semaphore, #tpu.memory_space<semaphore_mem>> -> memref<1x!tpu.dma_semaphore, #tpu.memory_space<semaphore_mem>>
      %79 = tpu.memref_squeeze %78 : memref<1x!tpu.dma_semaphore, #tpu.memory_space<semaphore_mem>> -> memref<!tpu.dma_semaphore, #tpu.memory_space<semaphore_mem>>
      tpu.enqueue_dma source(%75 : memref<8x256xf32, #tpu.memory_space<any>>) target(%77 : memref<8x256xf32, #tpu.memory_space<vmem>>) target_semaphore(%79 : memref<!tpu.dma_semaphore, #tpu.memory_space<semaphore_mem>>)
    } else {
    }
    %c0_i32_10 = arith.constant 0 : i32
    %c0_i32_11 = arith.constant 0 : i32
    %25 = tpu.memref_slice %arg6[%9, %c0_i32_10, %c0_i32_11] : memref<2x8x256xf32, #tpu.memory_space<vmem>> -> memref<1x8x256xf32, #tpu.memory_space<vmem>>
    %26 = tpu.memref_squeeze %25 : memref<1x8x256xf32, #tpu.memory_space<vmem>> -> memref<8x256xf32, #tpu.memory_space<vmem>>
    %c0 = arith.constant 0 : index
    %c0_12 = arith.constant 0 : index
    %27 = vector.load %26[%c0, %c0_12] : memref<8x256xf32, #tpu.memory_space<vmem>>, vector<8x128xf32>
    %c0_13 = arith.constant 0 : index
    %c0_14 = arith.constant 0 : index
    %28 = vector.load %arg8[%c0_13, %c0_14] : memref<72x128xf32, #tpu.memory_space<vmem>>, vector<8x128xf32>
    tpu.vector_store %arg8[%c0_13, %c0_14], %27 {strides = array<i32>} : memref<72x128xf32, #tpu.memory_space<vmem>>, vector<8x128xf32>,
    %c0_i32_15 = arith.constant 0 : i32
    %c0_i32_16 = arith.constant 0 : i32
    %29 = tpu.memref_slice %arg6[%9, %c0_i32_15, %c0_i32_16] : memref<2x8x256xf32, #tpu.memory_space<vmem>> -> memref<1x8x256xf32, #tpu.memory_space<vmem>>
    %30 = tpu.memref_squeeze %29 : memref<1x8x256xf32, #tpu.memory_space<vmem>> -> memref<8x256xf32, #tpu.memory_space<vmem>>
    %c0_17 = arith.constant 0 : index
    %c1 = arith.constant 1 : index
    %31 = vector.load %30[%c0_17, %c1] : memref<8x256xf32, #tpu.memory_space<vmem>>, vector<8x128xf32>
    %c8 = arith.constant 8 : index
    %c0_18 = arith.constant 0 : index
    %32 = vector.load %arg8[%c8, %c0_18] : memref<72x128xf32, #tpu.memory_space<vmem>>, vector<8x128xf32>
    tpu.vector_store %arg8[%c8, %c0_18], %31 {strides = array<i32>} : memref<72x128xf32, #tpu.memory_space<vmem>>, vector<8x128xf32>,
    %c0_i32_19 = arith.constant 0 : i32
    %c0_i32_20 = arith.constant 0 : i32
    %33 = tpu.memref_slice %arg6[%9, %c0_i32_19, %c0_i32_20] : memref<2x8x256xf32, #tpu.memory_space<vmem>> -> memref<1x8x256xf32, #tpu.memory_space<vmem>>
    %34 = tpu.memref_squeeze %33 : memref<1x8x256xf32, #tpu.memory_space<vmem>> -> memref<8x256xf32, #tpu.memory_space<vmem>>
    %c0_21 = arith.constant 0 : index
    %c2 = arith.constant 2 : index
    %35 = vector.load %34[%c0_21, %c2] : memref<8x256xf32, #tpu.memory_space<vmem>>, vector<8x128xf32>
    %c16 = arith.constant 16 : index
    %c0_22 = arith.constant 0 : index
    %36 = vector.load %arg8[%c16, %c0_22] : memref<72x128xf32, #tpu.memory_space<vmem>>, vector<8x128xf32>
    tpu.vector_store %arg8[%c16, %c0_22], %35 {strides = array<i32>} : memref<72x128xf32, #tpu.memory_space<vmem>>, vector<8x128xf32>,
    %c0_i32_23 = arith.constant 0 : i32
    %c0_i32_24 = arith.constant 0 : i32
    %37 = tpu.memref_slice %arg6[%9, %c0_i32_23, %c0_i32_24] : memref<2x8x256xf32, #tpu.memory_space<vmem>> -> memref<1x8x256xf32, #tpu.memory_space<vmem>>
    %38 = tpu.memref_squeeze %37 : memref<1x8x256xf32, #tpu.memory_space<vmem>> -> memref<8x256xf32, #tpu.memory_space<vmem>>
    %c0_25 = arith.constant 0 : index
    %c18 = arith.constant 18 : index
    %39 = vector.load %38[%c0_25, %c18] : memref<8x256xf32, #tpu.memory_space<vmem>>, vector<8x128xf32>
    %c24 = arith.constant 24 : index
    %c0_26 = arith.constant 0 : index
    %40 = vector.load %arg8[%c24, %c0_26] : memref<72x128xf32, #tpu.memory_space<vmem>>, vector<8x128xf32>
    tpu.vector_store %arg8[%c24, %c0_26], %39 {strides = array<i32>} : memref<72x128xf32, #tpu.memory_space<vmem>>, vector<8x128xf32>,
    %c0_i32_27 = arith.constant 0 : i32
    %c0_i32_28 = arith.constant 0 : i32
    %41 = tpu.memref_slice %arg6[%9, %c0_i32_27, %c0_i32_28] : memref<2x8x256xf32, #tpu.memory_space<vmem>> -> memref<1x8x256xf32, #tpu.memory_space<vmem>>
    %42 = tpu.memref_squeeze %41 : memref<1x8x256xf32, #tpu.memory_space<vmem>> -> memref<8x256xf32, #tpu.memory_space<vmem>>
    %c0_29 = arith.constant 0 : index
    %c19 = arith.constant 19 : index
    %43 = vector.load %42[%c0_29, %c19] : memref<8x256xf32, #tpu.memory_space<vmem>>, vector<8x128xf32>
    %c32 = arith.constant 32 : index
    %c0_30 = arith.constant 0 : index
    %44 = vector.load %arg8[%c32, %c0_30] : memref<72x128xf32, #tpu.memory_space<vmem>>, vector<8x128xf32>
    tpu.vector_store %arg8[%c32, %c0_30], %43 {strides = array<i32>} : memref<72x128xf32, #tpu.memory_space<vmem>>, vector<8x128xf32>,
    %c0_i32_31 = arith.constant 0 : i32
    %c0_i32_32 = arith.constant 0 : i32
    %45 = tpu.memref_slice %arg6[%9, %c0_i32_31, %c0_i32_32] : memref<2x8x256xf32, #tpu.memory_space<vmem>> -> memref<1x8x256xf32, #tpu.memory_space<vmem>>
    %46 = tpu.memref_squeeze %45 : memref<1x8x256xf32, #tpu.memory_space<vmem>> -> memref<8x256xf32, #tpu.memory_space<vmem>>
    %c0_33 = arith.constant 0 : index
    %c20 = arith.constant 20 : index
    %47 = vector.load %46[%c0_33, %c20] : memref<8x256xf32, #tpu.memory_space<vmem>>, vector<8x128xf32>
    %c40 = arith.constant 40 : index
    %c0_34 = arith.constant 0 : index
    %48 = vector.load %arg8[%c40, %c0_34] : memref<72x128xf32, #tpu.memory_space<vmem>>, vector<8x128xf32>
    tpu.vector_store %arg8[%c40, %c0_34], %47 {strides = array<i32>} : memref<72x128xf32, #tpu.memory_space<vmem>>, vector<8x128xf32>,
    %c0_i32_35 = arith.constant 0 : i32
    %c0_i32_36 = arith.constant 0 : i32
    %49 = tpu.memref_slice %arg6[%9, %c0_i32_35, %c0_i32_36] : memref<2x8x256xf32, #tpu.memory_space<vmem>> -> memref<1x8x256xf32, #tpu.memory_space<vmem>>
    %50 = tpu.memref_squeeze %49 : memref<1x8x256xf32, #tpu.memory_space<vmem>> -> memref<8x256xf32, #tpu.memory_space<vmem>>
    %c0_37 = arith.constant 0 : index
    %c36 = arith.constant 36 : index
    %51 = vector.load %50[%c0_37, %c36] : memref<8x256xf32, #tpu.memory_space<vmem>>, vector<8x128xf32>
    %c48 = arith.constant 48 : index
    %c0_38 = arith.constant 0 : index
    %52 = vector.load %arg8[%c48, %c0_38] : memref<72x128xf32, #tpu.memory_space<vmem>>, vector<8x128xf32>
    tpu.vector_store %arg8[%c48, %c0_38], %51 {strides = array<i32>} : memref<72x128xf32, #tpu.memory_space<vmem>>, vector<8x128xf32>,
    %c0_i32_39 = arith.constant 0 : i32
    %c0_i32_40 = arith.constant 0 : i32
    %53 = tpu.memref_slice %arg6[%9, %c0_i32_39, %c0_i32_40] : memref<2x8x256xf32, #tpu.memory_space<vmem>> -> memref<1x8x256xf32, #tpu.memory_space<vmem>>
    %54 = tpu.memref_squeeze %53 : memref<1x8x256xf32, #tpu.memory_space<vmem>> -> memref<8x256xf32, #tpu.memory_space<vmem>>
    %c0_41 = arith.constant 0 : index
    %c37 = arith.constant 37 : index
    %55 = vector.load %54[%c0_41, %c37] : memref<8x256xf32, #tpu.memory_space<vmem>>, vector<8x128xf32>
    %c56 = arith.constant 56 : index
    %c0_42 = arith.constant 0 : index
    %56 = vector.load %arg8[%c56, %c0_42] : memref<72x128xf32, #tpu.memory_space<vmem>>, vector<8x128xf32>
    tpu.vector_store %arg8[%c56, %c0_42], %55 {strides = array<i32>} : memref<72x128xf32, #tpu.memory_space<vmem>>, vector<8x128xf32>,
    %c0_i32_43 = arith.constant 0 : i32
    %c0_i32_44 = arith.constant 0 : i32
    %57 = tpu.memref_slice %arg6[%9, %c0_i32_43, %c0_i32_44] : memref<2x8x256xf32, #tpu.memory_space<vmem>> -> memref<1x8x256xf32, #tpu.memory_space<vmem>>
    %58 = tpu.memref_squeeze %57 : memref<1x8x256xf32, #tpu.memory_space<vmem>> -> memref<8x256xf32, #tpu.memory_space<vmem>>
    %c0_45 = arith.constant 0 : index
    %c38 = arith.constant 38 : index
    %59 = vector.load %58[%c0_45, %c38] : memref<8x256xf32, #tpu.memory_space<vmem>>, vector<8x128xf32>
    %c64 = arith.constant 64 : index
    %c0_46 = arith.constant 0 : index
    %60 = vector.load %arg8[%c64, %c0_46] : memref<72x128xf32, #tpu.memory_space<vmem>>, vector<8x128xf32>
    tpu.vector_store %arg8[%c64, %c0_46], %59 {strides = array<i32>} : memref<72x128xf32, #tpu.memory_space<vmem>>, vector<8x128xf32>,
    %c0_47 = arith.constant 0 : index
    %c0_48 = arith.constant 0 : index
    %61 = vector.load %arg3[%c0_47, %c0_48] : memref<8x72xf32, #tpu.memory_space<vmem>>, vector<8x72xf32>
    %c0_49 = arith.constant 0 : index
    %c0_50 = arith.constant 0 : index
    %62 = vector.load %arg8[%c0_49, %c0_50] : memref<72x128xf32, #tpu.memory_space<vmem>>, vector<72x128xf32>
    %cst = arith.constant dense<0.000000e+00> : vector<8x128xf32>
    %63 = tpu.matmul %61, %62, %cst {dimension_numbers = #tpu.dot_dimension_numbers<[1], [0], [0], [1], [0, 0, 1, 1], [], []>} : vector<8x72xf32>, vector<72x128xf32>, vector<8x128xf32> -> vector<8x128xf32>
    %c0_51 = arith.constant 0 : index
    %c0_52 = arith.constant 0 : index
    %64 = vector.load %arg4[%c0_51, %c0_52] : memref<8x1xf32, #tpu.memory_space<vmem>>, vector<8x1xf32>
    %65 = vector.broadcast %64 : vector<8x1xf32> to vector<8x128xf32>
    %66 = arith.addf %63, %65 : vector<8x128xf32>
    %c0_53 = arith.constant 0 : index
    %c0_54 = arith.constant 0 : index
    %c0_55 = arith.constant 0 : index
    %67 = vector.load %arg5[%c0_53, %c0_54, %c0_55] : memref<1x8x128xf32, #tpu.memory_space<vmem>>, vector<1x8x128xf32>
    %68 = vector.shape_cast %67 : vector<1x8x128xf32> to vector<8x128xf32>
    %69 = vector.shape_cast %66 : vector<8x128xf32> to vector<1x8x128xf32>
    tpu.vector_store %arg5[%c0_53, %c0_54, %c0_55], %69 {strides = array<i32>} : memref<1x8x128xf32, #tpu.memory_space<vmem>>, vector<1x8x128xf32>,
    return
  }
  func.func @transform_1(%arg0: i32, %arg1: i32) -> (i32, i32) {
    %c0_i32 = arith.constant 0 : i32
    %c0_i32_0 = arith.constant 0 : i32
    %c0_i32_1 = arith.constant 0 : i32
    return %c0_i32, %c0_i32_0 : i32, i32
  }
  func.func @transform_2(%arg0: i32, %arg1: i32) -> (i32, i32) {
    %c0_i32 = arith.constant 0 : i32
    %c0_i32_0 = arith.constant 0 : i32
    %c0_i32_1 = arith.constant 0 : i32
    return %c0_i32, %c0_i32_0 : i32, i32
  }
  func.func @transform_3(%arg0: i32, %arg1: i32) -> (i32, i32, i32) {
    %c0_i32 = arith.constant 0 : i32
    %c0_i32_0 = arith.constant 0 : i32
    return %arg0, %c0_i32, %arg1 : i32, i32, i32
  }
}

</mosaic_0001>

<bundles_post_ra>
// kernel: tpu_custom_call.1
= control target key start
LH: loop header
LB: loop body
LE: loop exit
PB: predicated region body
PF: predicated region fallthrough
CT: control target
= control target key end

     0   :  { %8 = vsyncpa [#allocation6], 0  ;;  %s1130_s0 = inlined_call_operand.hbm [shape: f32[2,8,512], index: 0, kind: input, shape index: {}]   ;;  %s1131_s1 = inlined_call_operand.vmem [shape: f32[8,72], index: 1, kind: input, shape index: {}]   ;;  %s1132_s2 = inlined_call_operand.vmem [shape: f32[8,1], index: 2, kind: input, shape index: {}]   ;;  %s1133_s3 = inlined_call_operand.hbm [shape: f32[2,8,384], index: 3, kind: output, shape index: {}]  }
   0x1   :  { %10 = vsyncpa [#allocation6 + $0x1], 0  ;;  %s899_s12 = smov 0   ;;  %s901_s13 = smov 0  }
   0x2   :  { %s903_s14 = smov 0   ;;  %s905_s15 = smov 0  }
   0x3   :  { %s907_s16 = smov 0   ;;  %s909_s17 = smov 0  }
   0x4   :  { %s911_s18 = smov 0   ;;  %s913_s19 = smov 0  }
   0x5 LB: > { %1145 = sst [smem:[#allocation15_spill]] %s843_s14  ;;  %s507_s20 = sadd.s32 4294967295, %s863_s19   ;;  %s863_s19 = sphi %s913_s19, %s16_s19   ;;  %s859_s18 = sphi %s911_s18, %s1168_s18   ;;  %s855_s17 = sphi %s909_s17, %s1167_s17   ;;  %s851_s16 = sphi %s907_s16, %s1166_s16   ;;  %s847_s15 = sphi %s905_s15, %s1165_s15   ;;  %s843_s14 = sphi %s903_s14, %s1164_s14   ;;  %s839_s13 = sphi %s901_s13, %s1170_s13   ;;  %s835_s12 = sphi %s899_s12, %s1169_s12  }
   0x6   : > { %1146 = sst [smem:[#allocation16_spill]] %s855_s17  ;;  %s508_s21 = sadd.s32 4294967294, %s863_s19  }
   0x7   : > { %1147 = sst [smem:[#allocation17_spill]] %s859_s18  ;;  %s25_s22 = sadd.s32 1, %s855_s17 }
   0x8   : > { %p26_p0 = scmp.ge.s32.totalorder %s25_s22, 3  ;;  %s28_s23 = sadd.s32 1, %s859_s18 }
   0x9   : > { %p89_p1 = scmp.ne.s32.totalorder %s843_s14, %s839_s13  ;;  %p90_p2 = scmp.eq.s32.totalorder %s507_s20, 5 }
   0xa   : > { %s1172_s22 = smov (%p26_p0, %s25_s22), 0  ;;  %s1174_s23 = smov (!%p26_p0, %s28_s23), %s859_s18 }
   0xb   : > { %1148 = sst [smem:[#allocation18_spill]] %s1172_s22  ;;  %s75_s24 = ssub.s32 %s855_s17, %s1172_s22 }
   0xc   : > { %p950_p3 = por %p90_p2, %p89_p1  ;;  %p30_p4 = scmp.ge.s32.totalorder %s1174_s23, 2 }
   0xd   : > { %p95_p5 = scmp.ne.s32.totalorder %s839_s13, %s835_s12  ;;  %p96_p6 = scmp.eq.s32.totalorder %s508_s21, 5 }
   0xe   : > { %s1149_s25 = scalar_select %p950_p3, 1, 0 }
   0xf   : > { %p510_p7 = scmp.ge.s32.totalorder %s863_s19, 1  ;;  %s1176_s23 = smov (%p30_p4, %s1174_s23), 0 }
  0x10   : > { %1150 = sst [smem:[#allocation19_spill]] %s1176_s23  ;;  %p959_p8 = por %p96_p6, %p95_p5 }
  0x11   : > { %p120_p9 = scmp.lt.s32.totalorder %s863_s19, 7  ;;  %s74_s27 = ssub.s32 %s859_s18, %s1176_s23 }
  0x12   : > { %s1151_s26 = scalar_select %p959_p8, 1, 0 }
  0x13   : > { %s79_s28 = sadd.s32 1, %s843_s14  ;;  %s76_s29 = sor.u32 %s75_s24, %s74_s27 }
  0x14   : > { %p121_p10 = pnand %p510_p7, %p120_p9  ;;  %p77_p11 = scmp.eq.s32.totalorder %s76_s29, 0 }
  0x15   : > { %s1134_s4 = sand.u32 (!%p121_p10), 1, %s839_s13   ;;  %p137_p12 = scmp.lt.s32.totalorder (!%p121_p10), %s847_s15, 0 }
  0x16   : > { %s968_s30 = scalar_select %p77_p11, %s843_s14, %s79_s28  }
  0x17   : > { %124 = sbr.rel (%p121_p10) target bundleno = 455 (0x1c7), region = 28  ;;  %s974_s5 = sshll.u32 (!%p121_p10), %s1134_s4, 3 }
  0x18   : > { %1152 = sst [smem:[#allocation20_spill]] %s968_s30  ;;  %s138_s6 = ssub.s32 (!%p121_p10), 0, %s847_s15 }
  0x19   : > { %s512_s7 = smin.u32 (!%p121_p10), %s847_s15, %s138_s6  ;;  %s1135_s10 = sshll.u32 (!%p121_p10), %s847_s15, 7 }
  0x1a   : > { %s140_s8 = sand.u32 (!%p121_p10), 1, %s512_s7   ;;  %s1136_s11 = sshll.u32 (!%p121_p10), %s851_s16, 2 }
  0x1b   : > { %s141_s9 = ssub.s32 (!%p121_p10), 0, %s140_s8  ;;  %s154_s21 = sshra.s32 (!%p121_p10), %s1135_s10, 7 }
  0x1c   : > { %p595_p0 = scmp.eq.s32.totalorder (!%p121_p10), %s847_s15, 0  ;;  %s157_s24 = sadd.s32 (!%p121_p10), %s1136_s11, %s154_s21 }
  0x1d   : > { %s518_s27 = sshll.u32 (!%p121_p10), %s157_s24, 7 }
  0x1e   : > { %s1178_s9 = smov (!%p137_p12, %s141_s9), %s140_s8  ;;  %s991_s7 = scalar_lea.hbm %s1130_s0, %s518_s27 }
  0x1f   : > { %p514_p13 = scmp.lt.s32.totalorder %s1178_s9, 0  ;;  %s147_s20 = sadd.s32 2, %s1178_s9 }
  0x20   : > { %s711_s10 = scalar_lea.hbm %s991_s7, 256  ;;  %s1139_s27 = scalar_lea.hbm %s1130_s0, 1024 }
  0x21   : > { %s1180_s20 = smov (!%p514_p13, %s147_s20), %s1178_s9  ;;  %p712_p1 = scmp.ne.s32.totalorder %s991_s7, %s711_s10 }
  0x22   : > { %s536_s28 = sshll.u32 %s1180_s20, 4  ;;  %s163_s4 = scalar_lea.sflag [#allocation3], %s1180_s20 }
  0x23   : > { %s993_s8 = scalar_lea.vmem [#allocation2], %s536_s28  ;;  %p713_p2 = pnand %p712_p1, %p595_p0 }
  0x24   : > { %s171_s9 = sshll.u32 %s993_s8, 4  ;;  %p716_p5 = scmp.lt.u32.totalorder %s991_s7, %s1130_s0  ;;  %s172_s9 = int_to_ptr.vmem [resolvable:$true] %s171_s9 }
  0x25   : > { %p714_p4 = pneg %p713_p2  ;;  %p717_p6 = scmp.lt.u32.totalorder %s1139_s27, %s711_s10 }
  0x26   : > { %p719_p9 = scmp.lt.u32.totalorder %s711_s10, %s991_s7 }
  0x27   : > { %p718_p7 = por %p717_p6, %p716_p5 }
  0x29   : > { %p720_p10 = por %p719_p9, %p718_p7 }
  0x2b   : > { %p721_p11 = pnand %p720_p10, %p714_p4 }
  0x2d   : > { %724 = shalt.err (!%p721_p11)  }
  0x2e   : > { %s725_s23 = scalar_lea.vmem %s172_s9, 256  ;;  %s865_s21 = smov [#allocation2]  }
  0x2f   : > { %p726_p12 = scmp.ne.s32.totalorder %s172_s9, %s725_s23  ;;  %s729_s24 = sshll.u32 %s865_s21, 4  ;;  %s1015_s24 = int_to_ptr.vmem [resolvable:$false] %s729_s24 }
  0x30   : > { %s1138_s11 = scalar_lea.vmem %s1015_s24, 512  ;;  %p732_p2 = scmp.lt.s32.totalorder %s172_s9, %s1015_s24 }
  0x31   : > { %p727_p13 = pnand %p726_p12, %p595_p0  ;;  %p733_p5 = scmp.lt.s32.totalorder %s1138_s11, %s725_s23 }
  0x33   : > { %p728_p1 = pneg %p727_p13  ;;  %p734_p6 = por %p733_p5, %p732_p2 }
  0x35   : > { %p735_p4 = pnand %p734_p6, %p728_p1 }
  0x37   : > { %738 = shalt.err (!%p735_p4)  }
  0x38   : > { %586 = dma.hbm_to_vmem [thread:$0]  (%p595_p0), %s991_s7, 256, %s172_s9, %s163_s4 }
  0x39   : > { %827 = dma.done.wait %s163_s4, 256 }
  0x3a   : > { %828 = vsyncadd %s163_s4, 4294967040  ;;  %s184_s29 = sadd.s32 1, %s847_s15  ;;  %s189_s6 = ssub.s32 1, %s1180_s20 }
  0x3b   : > { %p1027_p7 = scmp.lt.s32.totalorder %s184_s29, 3  ;;  %s1154_s23 = sshll.u32 %s847_s15, 7 }
  0x3c   : > { %s539_s21 = sadd.s32 128, %s1154_s23  ;;  %s540_s11 = sshll.u32 %s189_s6, 4 }
  0x3d   : > { %s191_s27 = sshra.s32 %s539_s21, 7  ;;  %s1155_s22 = sshll.u32 %s851_s16, 2 }
  0x3e   : > { %s194_s7 = sadd.s32 %s1155_s22, %s191_s27  ;;  %s199_s10 = scalar_lea.vmem [#allocation2], %s540_s11 }
  0x3f   : > { %s526_s9 = sshll.u32 %s194_s7, 7  ;;  %s208_s4 = sshll.u32 %s199_s10, 4  ;;  %s209_s4 = int_to_ptr.vmem [resolvable:$true] %s208_s4 }
  0x40   : > { %s196_s30 = scalar_lea.hbm %s1130_s0, %s526_s9  ;;  %s200_s20 = scalar_lea.sflag [#allocation3], %s189_s6 }
  0x41   : > { %s739_s29 = scalar_lea.hbm %s196_s30, 256  ;;  %p744_p11 = scmp.lt.u32.totalorder %s196_s30, %s1130_s0 }
  0x42   : > { %p740_p0 = scmp.ne.s32.totalorder %s196_s30, %s739_s29  ;;  %s1156_s27 = scalar_lea.hbm %s1130_s0, 1024 }
  0x43   : > { %p745_p12 = scmp.lt.u32.totalorder %s1156_s27, %s739_s29  ;;  %p747_p1 = scmp.lt.u32.totalorder %s739_s29, %s196_s30 }
  0x44   : > { %p741_p9 = pnand %p740_p0, %p1027_p7 }
  0x45   : > { %p746_p13 = por %p745_p12, %p744_p11 }
  0x46   : > { %p742_p10 = pneg %p741_p9 }
  0x47   : > { %p748_p2 = por %p747_p1, %p746_p13 }
  0x49   : > { %p749_p5 = pnand %p748_p2, %p742_p10 }
  0x4b   : > { %752 = shalt.err (!%p749_p5)  }
  0x4c   : > { %s753_s17 = scalar_lea.vmem %s209_s4, 256  ;;  %p760_p9 = scmp.lt.s32.totalorder %s209_s4, %s1015_s24 }
  0x4d   : > { %p754_p6 = scmp.ne.s32.totalorder %s209_s4, %s753_s17  ;;  %s1157_s14 = scalar_lea.vmem %s1015_s24, 512 }
  0x4e   : > { %p761_p8 = scmp.lt.s32.totalorder %s1157_s14, %s753_s17 }
  0x4f   : > { %p755_p4 = pnand %p754_p6, %p1027_p7 }
  0x50   : > { %p762_p3 = por %p761_p8, %p760_p9 }
  0x51   : > { %p756_p0 = pneg %p755_p4 }
  0x53   : > { %p763_p11 = pnand %p762_p3, %p756_p0 }
  0x55   : > { %766 = shalt.err (!%p763_p11)  }
  0x56   : > { %588 = dma.hbm_to_vmem [thread:$0]  (%p1027_p7), %s196_s30, 256, %s209_s4, %s200_s20  ;;  %v866_v0 = vmov 0.0|0.0   ;;  %vm873_vm0 = vmmov 0   ;;  %v874_v4 = vmov 0.0   ;;  %v875_v5 = vmov 0   ;;  %v320_v6 = vld [vmem:[%s1132_s2] sm:$0xff] }
  0x57   : > { %572 = vmatprep.subr.bf16.mxu0 %v866_v0  ;;  %v214_v1 = vld [vmem:[%s993_s8] sm:$0xff]  ;;  %v215_v2 = vld [vmem:[%s993_s8 + $0x8] sm:$0xff]  ;;  %s867_s18 = smov 127   ;;  %s868_s11 = smov 110   ;;  %569 = vmatprep.mubr.msk.f32.mxu0 %vm873_vm0, %v874_v4  ;;  %vm222_vm1 = vcmask 1039360   ;;  %vm246_vm2 = vcmask 900096  }
  0x58   : > { %v674_v3 = vpack.i.bf16 %v215_v2, %v214_v1  ;;  %s869_s24 = smov 126   ;;  %s870_s10 = smov 109   ;;  %709 = vset.pattern.permute.xlu1 %v875_v5  ;;  %710 = vset.pattern.permute.xlu0 %v875_v5  ;;  %vm234_vm3 = vcmask 1031168   ;;  %vm258_vm4 = vcmask 891904   ;;  %vm270_vm5 = vcmask 883712   ;;  %v310_v42 = vld [vmem:[%s1131_s1] sm:$0xff] }
  0x59   : > { %s871_s6 = smov 108   ;;  %s872_s28 = smov 92   ;;  %vm282_vm6 = vcmask 752640   ;;  %vm294_vm7 = vcmask 744448   ;;  %vm306_vm8 = vcmask 736256   ;;  %vm326_vm9 = vcmask 588800  }
  0x5a   : > { %675 = vrot.lane.b32.xlu0 %v674_v3, %s867_s18  ;;  %685 = vrot.lane.b32.xlu1 %v674_v3, %s868_s11  ;;  %s876_s30 = smov 91   ;;  %s877_s8 = smov 90  }
  0x5b   : > { %s584_s29 = smul.u32 3, %s851_s16  ;;  %s1158_s22 = scalar_lea.vmem [#allocation5], %s974_s5 }
  0x5c   : > { %s417_s27 = sshll.u32 %s1158_s22, 4  ;;  %s1159_s11 = smov %s1158_s22  ;;  %s1075_s27 = int_to_ptr.vmem [resolvable:$true] %s417_s27 }
  0x5d   : > { %s413_s23 = sadd.s32 %s847_s15, %s584_s29  ;;  %s1160_s15 = sand.u32 1, %s839_s13  }
  0x5e   : > { %680 = vrot.lane.b32.xlu0 %v674_v3, %s869_s24  ;;  %690 = vrot.lane.b32.xlu1 %v674_v3, %s870_s10  ;;  %s531_s21 = sshll.u32 %s413_s23, 7  ;;  %s402_s16 = scalar_lea.sflag [#allocation6], %s1160_s15 }
  0x5f   : > { %s1073_s18 = scalar_lea.hbm %s1133_s3, %s531_s21  ;;  %s767_s24 = scalar_lea.vmem %s1075_s27, 128 }
  0x60   : > { %p768_p3 = scmp.ne.s32.totalorder %s1075_s27, %s767_s24  ;;  %p1161_p8 = scmp.ne.s32.totalorder %s1149_s25, 0 }
  0x61   : > { %s878_s10 = smov [#allocation5]  }
  0x62   : > { %695 = vrot.lane.b32.xlu0 %v674_v3, %s871_s6  ;;  %700 = vrot.lane.b32.xlu1 %v674_v3, %s872_s28  ;;  %p769_p7 = pnand %p768_p3, %p1161_p8  ;;  %s771_s6 = sshll.u32 %s878_s10, 4  ;;  %s772_s6 = int_to_ptr.vmem [resolvable:$false] %s771_s6 }
  0x63   : > { %s773_s28 = scalar_lea.vmem %s772_s6, 256  ;;  %p774_p12 = scmp.lt.s32.totalorder %s1075_s27, %s772_s6 }
  0x64   : > { %p770_p10 = pneg %p769_p7  ;;  %p775_p13 = scmp.lt.s32.totalorder %s773_s28, %s767_s24 }
  0x66   : > { %705 = vrot.lane.b32.xlu0 %v674_v3, %s876_s30  ;;  %302 = vrot.lane.b32.xlu1 %v214_v1, %s877_s8  ;;  %p776_p1 = por %p775_p13, %p774_p12 }
  0x68   : > { %p777_p2 = pnand %p776_p1, %p770_p10 }
  0x6a   : > { %304 = vrot.lane.b32.xlu0 %v215_v2, %s877_s8  ;;  %323 = vperm.xlu1 %709, %v320_v6  }
  0xcc   : > { %v676_v7 = vpop.permute.xlu0 %675  ;;  %v686_v8 = vpop.permute.xlu1 %685 }
  0xcd   : > { %v678_v9 = vunpack.i.h.bf16 %v676_v7  ;;  %v677_v10 = vunpack.i.l.bf16 %v676_v7  ;;  %v688_v11 = vunpack.i.h.bf16 %v686_v8  ;;  %v687_v12 = vunpack.i.l.bf16 %v686_v8 }
  0xcf   : > { %v223_v13 = vsel %vm222_vm1, %v677_v10, %v678_v9  ;;  %v247_v17 = vsel %vm246_vm2, %v687_v12, %v688_v11 }
  0xd0   : > { %v681_v14 = vpop.permute.xlu0 %680  ;;  %v573_v15 = vpack.c.bf16 %v223_v13, %v214_v1  ;;  %v691_v16 = vpop.permute.xlu1 %690 }
  0xd1   : > { %v683_v18 = vunpack.i.h.bf16 %v681_v14  ;;  %v682_v19 = vunpack.i.l.bf16 %v681_v14  ;;  %v693_v20 = vunpack.i.h.bf16 %v691_v16  ;;  %v692_v21 = vunpack.i.l.bf16 %v691_v16 }
  0xd2   : > { %574 = vmatpush3.bf16.msra.mxu0 %v573_v15 }
  0xd3   : > { %575 = vmatprep.subr.bf16.mxu0 %v866_v0  ;;  %v235_v22 = vsel %vm234_vm3, %v682_v19, %v683_v18  ;;  %v259_v26 = vsel %vm258_vm4, %v692_v21, %v693_v20 }
  0xd4   : > { %v696_v23 = vpop.permute.xlu0 %695  ;;  %v576_v24 = vpack.c.bf16 %v247_v17, %v235_v22  ;;  %v701_v25 = vpop.permute.xlu1 %700 }
  0xd5   : > { %v698_v27 = vunpack.i.h.bf16 %v696_v23  ;;  %v697_v28 = vunpack.i.l.bf16 %v696_v23  ;;  %v703_v29 = vunpack.i.h.bf16 %v701_v25  ;;  %v702_v30 = vunpack.i.l.bf16 %v701_v25 }
  0xd6   : > { %577 = vmatpush3.bf16.msra.mxu0 %v576_v24 }
  0xd7   : > { %578 = vmatprep.subr.bf16.mxu0 %v866_v0  ;;  %v271_v31 = vsel %vm270_vm5, %v697_v28, %v698_v27  ;;  %v283_v36 = vsel %vm282_vm6, %v702_v30, %v703_v29 }
  0xd8   : > { %v706_v32 = vpop.permute.xlu0 %705  ;;  %v579_v33 = vpack.c.bf16 %v271_v31, %v259_v26  ;;  %v303_v39 = vpop.permute.xlu1 %302 }
  0xd9   : > { %v708_v34 = vunpack.i.h.bf16 %v706_v32  ;;  %v707_v35 = vunpack.i.l.bf16 %v706_v32 }
  0xda   : > { %580 = vmatpush3.bf16.msra.mxu0 %v579_v33 }
  0xdb   : > { %581 = vmatprep.subr.bf16.mxu0 %v866_v0  ;;  %v295_v37 = vsel %vm294_vm7, %v707_v35, %v708_v34 }
  0xdc   : > { %v582_v38 = vpack.c.bf16 %v295_v37, %v283_v36  ;;  %v305_v40 = vpop.permute.xlu0 %304 }
  0xdd   : > { %v307_v41 = vsel %vm306_vm8, %v303_v39, %v305_v40 }
  0xde   : > { %583 = vmatpush3.bf16.msra.mxu0 %v582_v38 }
  0xdf   : > { %567 = vmatprep.subr.mxu0 %v874_v4 }
  0xe2   : > { %568 = vmatpush3.msra.mxu0 %v307_v41 }
  0xe3   : > { %570 = vmatmul.mubr.msk.f32.vlgmr.msra.gmra.mrb[0].mxu0 %vm326_vm9, %v310_v42 }
  0xe9   : > { %v324_v43 = vpop.permute.xlu1 %323 }
 0x1b6   : > { %v396_v44 = vpop.f32.mrb[0].mxu0 }
 0x1b7   : > { %v397_v45 = vadd.f32 %v396_v44, %v324_v43  ;;  %v571_v46 = vpop.f32.mrb[1].mxu0 }
 0x1b9   : > { %400 = vst [vmem:[%s1159_s11] sm:$0xff] %v397_v45 }
 0x1ba   : > { %780 = shalt.err (!%p777_p2)
}
 0x1bb   : > { %s781_s5 = scalar_lea.hbm %s1073_s18, 128  ;;  %s785_s7 = scalar_lea.hbm %s1133_s3, 768 }
 0x1bc   : > { %p782_p5 = scmp.ne.s32.totalorder %s1073_s18, %s781_s5  ;;  %p786_p0 = scmp.lt.u32.totalorder %s1073_s18, %s1133_s3 }
 0x1bd   : > { %p787_p9 = scmp.lt.u32.totalorder %s785_s7, %s781_s5  ;;  %p789_p3 = scmp.lt.u32.totalorder %s781_s5, %s1073_s18 }
 0x1be   : > { %p783_p6 = pnand %p782_p5, %p1161_p8 }
 0x1bf   : > { %p788_p11 = por %p787_p9, %p786_p0 }
 0x1c0   : > { %p784_p4 = pneg %p783_p6 }
 0x1c1   : > { %p790_p7 = por %p789_p3, %p788_p11 }
 0x1c3   : > { %p791_p10 = pnand %p790_p7, %p784_p4 }
 0x1c5   : > { %794 = shalt.err (!%p791_p10)
}
 0x1c6   : > { %589 = dma.vmem_to_hbm [thread:$0]  (%p1161_p8), %s1075_s27, 128, %s1073_s18, %s402_s16  }
 0x1c7 PF: > { %p597_p12 = scmp.ge.s32.totalorder %s863_s19, 2  ;;  %s429_s20 = sand.u32 1, %s835_s12  }
 0x1c8   : > { %p1162_p13 = scmp.ne.s32.totalorder %s1151_s26, 0  ;;  %s430_s29 = scalar_lea.sflag [#allocation6], %s429_s20 }
 0x1ca   : > { %p592_p1 = pnand %p597_p12, %p1162_p13 }
 0x1cc   : > { %830 = dma.done.wait (!%p592_p1), %s430_s29, 128  }
 0x1cd   : > { %832 = vsyncadd (!%p592_p1), %s430_s29, 4294967168  ;;  %s16_s19 = sadd.s32 1, %s863_s19   ;;  %s1163_s23 = sld [smem:[#allocation15_spill]] }
 0x1ce   : > { %p13_p2 = scmp.ge.s32.totalorder %s16_s19, 8   ;;  %s1164_s14 = sld [smem:[#allocation20_spill]] }
 0x1cf   : > { %s1165_s15 = sld [smem:[#allocation16_spill]]  ;;  %s1166_s16 = sld [smem:[#allocation17_spill]] }
 0x1d0   : > { %s1167_s17 = sld [smem:[#allocation18_spill]]  ;;  %s1168_s18 = sld [smem:[#allocation19_spill]] }
 0x1d1   : > { %s1169_s12 = smov %s839_s13  ;;  %15 = sbr.rel (!%p13_p2) target bundleno = 5 (0x5), region = 85 }
 0x1d3   : > { %s1170_s13 = smov %s1163_s23 }
 0x1d8   :  { %435 = vsyncpa [#allocation6], 1 }
 0x1d9   :  { %437 = vsyncpa [#allocation6 + $0x1], 1 }
 0x1da   :  { %438 = vsyncmov [#allocation3] }
 0x1dd   :  { %s439_s25 = vpop.sfrf %438 }
 0x1de   :  { %p534_p8 = scmp.ne.s32.totalorder %s439_s25, 0 }
 0x1e0   :  { %443 = shalt.err (%p534_p8)  }
 0x1e1   :  { %445 = vsyncmov [#allocation3 + $0x1] }
 0x1e4   :  { %s446_s26 = vpop.sfrf %445 }
 0x1e5   :  { %p535_p5 = scmp.ne.s32.totalorder %s446_s26, 0 }
 0x1e7   :  { %450 = shalt.err (%p535_p5)  }

</bundles_post_ra>
